<compile_context>
chip_gen: v7x
topology: tpu7x:2x2x1
jax: 0.10.0
libtpu: 0.0.40
codegen_flags: <defaults>
</compile_context>

<pallas_src>
import functools

import numpy as np
import jax
import jax.numpy as jnp
from jax.experimental import pallas as pl
from jax.experimental.pallas import tpu as pltpu

LOG_SIG_MAX = 2.0
LOG_SIG_MIN = -20.0


def positional_encoding_host(seq, hidden):
    """Matches positional_encoding(a, b, c, x) per-sequence part (f64, like torch.double)."""
    pos = np.arange(seq, dtype=np.float64)
    ind = 10.0 ** np.arange(hidden // 2, dtype=np.float64)
    pe = np.einsum("i,j->ij", pos, ind)                      # (seq, hidden//2)
    pe = np.stack([np.sin(pe), np.cos(pe)], axis=-1)         # (seq, hidden//2, 2)
    pe = pe.reshape(seq, hidden)                             # interleaved sin/cos
    return jnp.asarray(pe, dtype=jnp.float32)


def _mxu(a, w):
    """bf16 operands at the MXU boundary, f32 accumulation."""
    return jnp.dot(a.astype(jnp.bfloat16), w.astype(jnp.bfloat16),
                   preferred_element_type=jnp.float32)


def _encoder_kernel(x_ref, pe_ref, win_ref, w1_ref, b1_ref, w2_ref, b2_ref,
                    whead_ref, bhead_ref, eps_ref, out_ref,
                    *, bt, seq, dout, n_layers):
    # One grid step == one batch tile of `bt` rows, flattened to (bt*seq, .) on host.
    # fcin + positional encoding (fcin bias folded into pe on the host).
    z = _mxu(x_ref[...], win_ref[...]) + pe_ref[...]               # (bt*seq, H) f32
    # stacked1[0]: relu(linear) per position ...
    h1 = jnp.maximum(_mxu(z, w1_ref[...]) + b1_ref[...], 0.0)      # (bt*seq, H)
    # ... then sum over the sequence axis: sublane/XLU reduction over the (bt, seq, H) view.
    zsum = jnp.sum(h1.reshape(bt, seq, h1.shape[-1]), axis=1)      # (bt, H)
    # stacked2[0]: relu(linear), divided by len(stacked2) (== n_layers).
    out = jnp.maximum(_mxu(zsum, w2_ref[...]) + b2_ref[...], 0.0) * (1.0 / n_layers)
    # Fused heads: one matmul producing [mu | log_std].
    head = _mxu(out, whead_ref[...]) + bhead_ref[...]              # (bt, 2*dout)
    mu = head[:, :dout]
    std = jnp.exp(jnp.clip(head[:, dout:], LOG_SIG_MIN, LOG_SIG_MAX))
    # Normal(mu, std).rsample() == mu + std * eps, eps ~ N(0,1) supplied by host.
    sample = mu + std * eps_ref[...]
    # Single (bt, 3*dout) store per step: [sample | mu | std].
    out_ref[...] = jnp.concatenate([sample, mu, std], axis=-1)


def encoder_transformer_forward(x, packed, eps, *, n_layers=1):
    a, s, din = x.shape
    h = packed["w1"].shape[0]
    dout = packed["w_head"].shape[1] // 2

    # Batch tile: largest divisor of `a` that is <= 128.  For small batches
    # (e.g. a == 2) this collapses the whole problem to a single grid step.
    bt = a
    if a > 128:
        bt = max(d for d in range(1, 129) if a % d == 0)
    grid = (a // bt,)

    # Host-side layout plumbing (tiny): flatten batch into the sublane dim so
    # every in-kernel matmul is a plain 2-D MXU dot, and tile the (seq, H)
    # positional encoding (+ folded fcin bias) to one resident (bt*s, H) slab.
    x_flat = x.reshape(a * s, din)
    pe_tile = jnp.tile(packed["pe_b"], (bt, 1))                    # (bt*s, H)

    kernel = functools.partial(_encoder_kernel, bt=bt, seq=s, dout=dout,
                               n_layers=n_layers)

    flops = (2 * a * s * din * h + 2 * a * s * h * h
             + 2 * a * h * h + 2 * a * h * (2 * dout))
    bytes_accessed = int(
        x.size * 4 + pe_tile.size * 4 + eps.size * 4 + a * 3 * dout * 4
        + sum(int(np.prod(packed[k].shape)) * packed[k].dtype.itemsize
              for k in ("w_in", "w1", "b1", "w2", "b2", "w_head", "b_head")))

    def full(arr):
        return pl.BlockSpec(tuple(arr.shape), lambda i: (0,) * arr.ndim)

    out = pl.pallas_call(
        kernel,
        out_shape=jax.ShapeDtypeStruct((a, 3 * dout), jnp.float32),
        grid=grid,
        in_specs=[
            pl.BlockSpec((bt * s, din), lambda i: (i, 0)),         # x batch tile
            pl.BlockSpec((bt * s, h), lambda i: (0, 0)),           # pe (+ fcin bias): resident
            full(packed["w_in"]),
            full(packed["w1"]), full(packed["b1"]),
            full(packed["w2"]), full(packed["b2"]),
            full(packed["w_head"]), full(packed["b_head"]),
            pl.BlockSpec((bt, dout), lambda i: (i, 0)),            # eps batch tile
        ],
        out_specs=pl.BlockSpec((bt, 3 * dout), lambda i: (i, 0)),
        compiler_params=pltpu.CompilerParams(
            dimension_semantics=("parallel",),
        ),
        cost_estimate=pl.CostEstimate(flops=flops, transcendentals=a * dout,
                                      bytes_accessed=bytes_accessed),
    )(x_flat, pe_tile,
      packed["w_in"], packed["w1"], packed["b1"],
      packed["w2"], packed["b2"], packed["w_head"], packed["b_head"],
      eps)

    sample, mu, std = out[:, :dout], out[:, dout:2 * dout], out[:, 2 * dout:]
    # TODO(synk): torch.distributions.Normal object has no Pallas/JAX return
    # equivalent; (mu, std) fully determine it.
    return sample, mu, std


def init_params(key, input_dim, output_dim, hidden_dim):
    """PyTorch-Linear-style init; weights stored transposed (in, out) so y = x @ W + b."""
    def linear(k, fan_in, fan_out):
        kw, kb = jax.random.split(k)
        bound = 1.0 / np.sqrt(fan_in)
        w = jax.random.uniform(kw, (fan_in, fan_out), jnp.float32, -bound, bound)
        bias = jax.random.uniform(kb, (1, fan_out), jnp.float32, -bound, bound)
        return w, bias

    ks = jax.random.split(key, 5)
    w_in, b_in = linear(ks[0], input_dim, hidden_dim)
    w1, b1 = linear(ks[1], hidden_dim, hidden_dim)     # stacked1[0]
    w2, b2 = linear(ks[2], hidden_dim, hidden_dim)     # stacked2[0]
    w_mu, b_mu = linear(ks[3], hidden_dim, output_dim)
    w_ls, b_ls = linear(ks[4], hidden_dim, output_dim)
    return dict(w_in=w_in, b_in=b_in, w1=w1, b1=b1, w2=w2, b2=b2,
                w_mu=w_mu, b_mu=b_mu, w_ls=w_ls, b_ls=b_ls)


def pack_params(params, seq):
    """Host-side packing: fold fcin bias into the positional encoding, fuse the
    mu/log_std heads, cast matmul weights to bf16 (biases / accumulation stay f32)."""
    hidden = params["w_in"].shape[1]
    pe_b = positional_encoding_host(seq, hidden) + params["b_in"]       # (seq, H) f32
    return dict(
        pe_b=pe_b,
        w_in=params["w_in"].astype(jnp.bfloat16),
        w1=params["w1"].astype(jnp.bfloat16), b1=params["b1"],
        w2=params["w2"].astype(jnp.bfloat16), b2=params["b2"],
        w_head=jnp.concatenate([params["w_mu"], params["w_ls"]], axis=1).astype(jnp.bfloat16),
        b_head=jnp.concatenate([params["b_mu"], params["b_ls"]], axis=1),
    )


def reference_forward(x, packed, eps, *, n_layers=1):
    """Plain-JAX reference mirroring the PyTorch forward (layers == 1) with the same
    bf16-at-the-MXU / f32-accumulation numerics as the kernel."""
    dout = packed["w_head"].shape[1] // 2
    z = _mxu(x, packed["w_in"]) + packed["pe_b"][None]             # (B, S, H)
    h1 = jax.nn.relu(_mxu(z, packed["w1"]) + packed["b1"])
    zsum = h1.sum(axis=1)                                          # sum over sequence
    out = jax.nn.relu(_mxu(zsum, packed["w2"]) + packed["b2"]) / n_layers
    head = _mxu(out, packed["w_head"]) + packed["b_head"]
    mu = head[:, :dout]
    std = jnp.exp(jnp.clip(head[:, dout:], LOG_SIG_MIN, LOG_SIG_MAX))
    return mu + std * eps, mu, std


if __name__ == "__main__":
    batch, seq, input_dim, hidden_dim, output_dim = 2, 8, 4, 32, 8

    key = jax.random.PRNGKey(0)
    k_param, k_x, k_eps = jax.random.split(key, 3)
    params = init_params(k_param, input_dim, output_dim, hidden_dim)
    packed = pack_params(params, seq)
    x = jax.random.normal(k_x, (batch, seq, input_dim), jnp.float32)
    eps = jax.random.normal(k_eps, (batch, output_dim), jnp.float32)

    sample, mu, std = encoder_transformer_forward(x, packed, eps)
    jax.block_until_ready((sample, mu, std))

    ref_sample, ref_mu, ref_std = reference_forward(x, packed, eps)
    np.testing.assert_allclose(np.asarray(mu), np.asarray(ref_mu), rtol=1e-3, atol=1e-3)
    np.testing.assert_allclose(np.asarray(std), np.asarray(ref_std), rtol=1e-3, atol=1e-3)
    np.testing.assert_allclose(np.asarray(sample), np.asarray(ref_sample), rtol=1e-3, atol=1e-3)

    print("KERNEL_OK")
</pallas_src>

<mosaic_0001>
module attributes {stable_mosaic.version = 11 : i64} {
  func.func @_encoder_kernel(%arg0: i32, %arg1: memref<16x4xf32, #tpu.memory_space<vmem>>, %arg2: memref<16x32xf32, #tpu.memory_space<vmem>>, %arg3: memref<4x32xbf16, #tpu.memory_space<vmem>>, %arg4: memref<32x32xbf16, #tpu.memory_space<vmem>>, %arg5: memref<1x32xf32, #tpu.memory_space<vmem>>, %arg6: memref<32x32xbf16, #tpu.memory_space<vmem>>, %arg7: memref<1x32xf32, #tpu.memory_space<vmem>>, %arg8: memref<32x16xbf16, #tpu.memory_space<vmem>>, %arg9: memref<1x16xf32, #tpu.memory_space<vmem>>, %arg10: memref<2x8xf32, #tpu.memory_space<vmem>>, %arg11: memref<2x24xf32, #tpu.memory_space<vmem>>) attributes {dimension_semantics = [#tpu.dimension_semantics<parallel>], iteration_bounds = array<i64: 1>, scalar_prefetch = 0 : i64, scratch_operands = 0 : i64, tpu.core_type = #tpu.core_type<tc>, window_params = [{transform_indices = @transform_0, window_bounds = array<i64: 16, 4>}, {pipeline_mode = #tpu.pipeline_mode<synchronous>, transform_indices = @transform_1, window_bounds = array<i64: 16, 32>}, {pipeline_mode = #tpu.pipeline_mode<synchronous>, transform_indices = @transform_2, window_bounds = array<i64: 4, 32>}, {pipeline_mode = #tpu.pipeline_mode<synchronous>, transform_indices = @transform_3, window_bounds = array<i64: 32, 32>}, {pipeline_mode = #tpu.pipeline_mode<synchronous>, transform_indices = @transform_4, window_bounds = array<i64: 1, 32>}, {pipeline_mode = #tpu.pipeline_mode<synchronous>, transform_indices = @transform_5, window_bounds = array<i64: 32, 32>}, {pipeline_mode = #tpu.pipeline_mode<synchronous>, transform_indices = @transform_6, window_bounds = array<i64: 1, 32>}, {pipeline_mode = #tpu.pipeline_mode<synchronous>, transform_indices = @transform_7, window_bounds = array<i64: 32, 16>}, {pipeline_mode = #tpu.pipeline_mode<synchronous>, transform_indices = @transform_8, window_bounds = array<i64: 1, 16>}, {transform_indices = @transform_9, window_bounds = array<i64: 2, 8>}, {transform_indices = @transform_10, window_bounds = array<i64: 2, 24>}]} {
    %c0 = arith.constant 0 : index
    %c0_0 = arith.constant 0 : index
    %0 = vector.load %arg1[%c0, %c0_0] : memref<16x4xf32, #tpu.memory_space<vmem>>, vector<16x4xf32>
    %c0_1 = arith.constant 0 : index
    %c0_2 = arith.constant 0 : index
    %1 = vector.load %arg3[%c0_1, %c0_2] : memref<4x32xbf16, #tpu.memory_space<vmem>>, vector<4x32xbf16>
    %2 = arith.truncf %0 : vector<16x4xf32> to vector<16x4xbf16>
    %cst = arith.constant dense<0.000000e+00> : vector<16x32xf32>
    %3 = tpu.matmul %2, %1, %cst {dimension_numbers = #tpu.dot_dimension_numbers<[1], [0], [0], [1], [0, 0, 1, 1], [], []>} : vector<16x4xbf16>, vector<4x32xbf16>, vector<16x32xf32> -> vector<16x32xf32>
    %c0_3 = arith.constant 0 : index
    %c0_4 = arith.constant 0 : index
    %4 = vector.load %arg2[%c0_3, %c0_4] : memref<16x32xf32, #tpu.memory_space<vmem>>, vector<16x32xf32>
    %5 = arith.addf %3, %4 : vector<16x32xf32>
    %c0_5 = arith.constant 0 : index
    %c0_6 = arith.constant 0 : index
    %6 = vector.load %arg4[%c0_5, %c0_6] : memref<32x32xbf16, #tpu.memory_space<vmem>>, vector<32x32xbf16>
    %7 = arith.truncf %5 : vector<16x32xf32> to vector<16x32xbf16>
    %cst_7 = arith.constant dense<0.000000e+00> : vector<16x32xf32>
    %8 = tpu.matmul %7, %6, %cst_7 {dimension_numbers = #tpu.dot_dimension_numbers<[1], [0], [0], [1], [0, 0, 1, 1], [], []>} : vector<16x32xbf16>, vector<32x32xbf16>, vector<16x32xf32> -> vector<16x32xf32>
    %c0_8 = arith.constant 0 : index
    %c0_9 = arith.constant 0 : index
    %9 = vector.load %arg5[%c0_8, %c0_9] : memref<1x32xf32, #tpu.memory_space<vmem>>, vector<1x32xf32>
    %10 = vector.broadcast %9 : vector<1x32xf32> to vector<16x32xf32>
    %11 = arith.addf %8, %10 : vector<16x32xf32>
    %cst_10 = arith.constant 0.000000e+00 : f32
    %12 = vector.broadcast %cst_10 : f32 to vector<16x32xf32>
    %13 = arith.maximumf %11, %12 : vector<16x32xf32>
    %14 = vector.shape_cast %13 : vector<16x32xf32> to vector<2x8x32xf32>
    %cst_11 = arith.constant dense<0.000000e+00> : vector<2x32xf32>
    %15 = vector.multi_reduction <add>, %14, %cst_11 [1] : vector<2x8x32xf32> to vector<2x32xf32>
    %c0_12 = arith.constant 0 : index
    %c0_13 = arith.constant 0 : index
    %16 = vector.load %arg6[%c0_12, %c0_13] : memref<32x32xbf16, #tpu.memory_space<vmem>>, vector<32x32xbf16>
    %17 = arith.truncf %15 : vector<2x32xf32> to vector<2x32xbf16>
    %cst_14 = arith.constant dense<0.000000e+00> : vector<2x32xf32>
    %18 = tpu.matmul %17, %16, %cst_14 {dimension_numbers = #tpu.dot_dimension_numbers<[1], [0], [0], [1], [0, 0, 1, 1], [], []>} : vector<2x32xbf16>, vector<32x32xbf16>, vector<2x32xf32> -> vector<2x32xf32>
    %c0_15 = arith.constant 0 : index
    %c0_16 = arith.constant 0 : index
    %19 = vector.load %arg7[%c0_15, %c0_16] : memref<1x32xf32, #tpu.memory_space<vmem>>, vector<1x32xf32>
    %20 = vector.broadcast %19 : vector<1x32xf32> to vector<2x32xf32>
    %21 = arith.addf %18, %20 : vector<2x32xf32>
    %cst_17 = arith.constant 0.000000e+00 : f32
    %22 = vector.broadcast %cst_17 : f32 to vector<2x32xf32>
    %23 = arith.maximumf %21, %22 : vector<2x32xf32>
    %cst_18 = arith.constant 1.000000e+00 : f32
    %24 = vector.broadcast %cst_18 : f32 to vector<2x32xf32>
    %25 = arith.mulf %23, %24 : vector<2x32xf32>
    %c0_19 = arith.constant 0 : index
    %c0_20 = arith.constant 0 : index
    %26 = vector.load %arg8[%c0_19, %c0_20] : memref<32x16xbf16, #tpu.memory_space<vmem>>, vector<32x16xbf16>
    %27 = arith.truncf %25 : vector<2x32xf32> to vector<2x32xbf16>
    %cst_21 = arith.constant dense<0.000000e+00> : vector<2x16xf32>
    %28 = tpu.matmul %27, %26, %cst_21 {dimension_numbers = #tpu.dot_dimension_numbers<[1], [0], [0], [1], [0, 0, 1, 1], [], []>} : vector<2x32xbf16>, vector<32x16xbf16>, vector<2x16xf32> -> vector<2x16xf32>
    %c0_22 = arith.constant 0 : index
    %c0_23 = arith.constant 0 : index
    %29 = vector.load %arg9[%c0_22, %c0_23] : memref<1x16xf32, #tpu.memory_space<vmem>>, vector<1x16xf32>
    %30 = vector.broadcast %29 : vector<1x16xf32> to vector<2x16xf32>
    %31 = arith.addf %28, %30 : vector<2x16xf32>
    %32 = vector.extract_strided_slice %31 {offsets = [0, 0], sizes = [2, 8], strides = [1, 1]} : vector<2x16xf32> to vector<2x8xf32>
    %33 = vector.extract_strided_slice %31 {offsets = [0, 8], sizes = [2, 8], strides = [1, 1]} : vector<2x16xf32> to vector<2x8xf32>
    %cst_24 = arith.constant -2.000000e+01 : f32
    %cst_25 = arith.constant 2.000000e+00 : f32
    %34 = vector.broadcast %cst_24 : f32 to vector<2x8xf32>
    %35 = arith.maximumf %34, %33 : vector<2x8xf32>
    %36 = vector.broadcast %cst_25 : f32 to vector<2x8xf32>
    %37 = arith.minimumf %36, %35 : vector<2x8xf32>
    %38 = math.exp %37 : vector<2x8xf32>
    %c0_26 = arith.constant 0 : index
    %c0_27 = arith.constant 0 : index
    %39 = vector.load %arg10[%c0_26, %c0_27] : memref<2x8xf32, #tpu.memory_space<vmem>>, vector<2x8xf32>
    %40 = arith.mulf %38, %39 : vector<2x8xf32>
    %41 = arith.addf %32, %40 : vector<2x8xf32>
    %42 = tpu.concatenate %41, %32, %38 in 1 : vector<2x8xf32>, vector<2x8xf32>, vector<2x8xf32> -> vector<2x24xf32>
    %c0_28 = arith.constant 0 : index
    %c0_29 = arith.constant 0 : index
    %43 = vector.load %arg11[%c0_28, %c0_29] : memref<2x24xf32, #tpu.memory_space<vmem>>, vector<2x24xf32>
    tpu.vector_store %arg11[%c0_28, %c0_29], %42 {strides = array<i32>} : memref<2x24xf32, #tpu.memory_space<vmem>>, vector<2x24xf32>,
    return
  }
  func.func @transform_0(%arg0: i32) -> (i32, i32) {
    %c0_i32 = arith.constant 0 : i32
    %c0_i32_0 = arith.constant 0 : i32
    return %arg0, %c0_i32 : i32, i32
  }
  func.func @transform_1(%arg0: i32) -> (i32, i32) {
    %c0_i32 = arith.constant 0 : i32
    %c0_i32_0 = arith.constant 0 : i32
    %c0_i32_1 = arith.constant 0 : i32
    return %c0_i32, %c0_i32_0 : i32, i32
  }
  func.func @transform_2(%arg0: i32) -> (i32, i32) {
    %c0_i32 = arith.constant 0 : i32
    %c0_i32_0 = arith.constant 0 : i32
    %c0_i32_1 = arith.constant 0 : i32
    return %c0_i32, %c0_i32_0 : i32, i32
  }
  func.func @transform_3(%arg0: i32) -> (i32, i32) {
    %c0_i32 = arith.constant 0 : i32
    %c0_i32_0 = arith.constant 0 : i32
    %c0_i32_1 = arith.constant 0 : i32
    return %c0_i32, %c0_i32_0 : i32, i32
  }
  func.func @transform_4(%arg0: i32) -> (i32, i32) {
    %c0_i32 = arith.constant 0 : i32
    %c0_i32_0 = arith.constant 0 : i32
    %c0_i32_1 = arith.constant 0 : i32
    return %c0_i32, %c0_i32_0 : i32, i32
  }
  func.func @transform_5(%arg0: i32) -> (i32, i32) {
    %c0_i32 = arith.constant 0 : i32
    %c0_i32_0 = arith.constant 0 : i32
    %c0_i32_1 = arith.constant 0 : i32
    return %c0_i32, %c0_i32_0 : i32, i32
  }
  func.func @transform_6(%arg0: i32) -> (i32, i32) {
    %c0_i32 = arith.constant 0 : i32
    %c0_i32_0 = arith.constant 0 : i32
    %c0_i32_1 = arith.constant 0 : i32
    return %c0_i32, %c0_i32_0 : i32, i32
  }
  func.func @transform_7(%arg0: i32) -> (i32, i32) {
    %c0_i32 = arith.constant 0 : i32
    %c0_i32_0 = arith.constant 0 : i32
    %c0_i32_1 = arith.constant 0 : i32
    return %c0_i32, %c0_i32_0 : i32, i32
  }
  func.func @transform_8(%arg0: i32) -> (i32, i32) {
    %c0_i32 = arith.constant 0 : i32
    %c0_i32_0 = arith.constant 0 : i32
    %c0_i32_1 = arith.constant 0 : i32
    return %c0_i32, %c0_i32_0 : i32, i32
  }
  func.func @transform_9(%arg0: i32) -> (i32, i32) {
    %c0_i32 = arith.constant 0 : i32
    %c0_i32_0 = arith.constant 0 : i32
    return %arg0, %c0_i32 : i32, i32
  }
  func.func @transform_10(%arg0: i32) -> (i32, i32) {
    %c0_i32 = arith.constant 0 : i32
    %c0_i32_0 = arith.constant 0 : i32
    return %arg0, %c0_i32 : i32, i32
  }
}

</mosaic_0001>

<bundles_post_ra>
// kernel: tpu_custom_call.1
= control target key start
LH: loop header
LB: loop body
LE: loop exit
PB: predicated region body
PF: predicated region fallthrough
CT: control target
= control target key end

     0   :  { %vm47_vm0 = vcmask 1041408   ;;  %v454_v2 = vmov 0.0   ;;  %vm455_vm1 = vmmov 0   ;;  %vm43_vm2 = vcmask 31744   ;;  %s580_s0 = inlined_call_operand.vmem [shape: f32[16,4], index: 0, kind: input, shape index: {}]   ;;  %s581_s1 = inlined_call_operand.vmem [shape: f32[16,32], index: 1, kind: input, shape index: {}]   ;;  %s582_s2 = inlined_call_operand.vmem [shape: bf16[4,32], index: 2, kind: input, shape index: {}]   ;;  %s583_s3 = inlined_call_operand.vmem [shape: bf16[32,32], index: 3, kind: input, shape index: {}]   ;;  %s584_s4 = inlined_call_operand.vmem [shape: f32[1,32], index: 4, kind: input, shape index: {}]   ;;  %s585_s5 = inlined_call_operand.vmem [shape: bf16[32,32], index: 5, kind: input, shape index: {}]   ;;  %s586_s6 = inlined_call_operand.vmem [shape: f32[1,32], index: 6, kind: input, shape index: {}]   ;;  %s587_s7 = inlined_call_operand.vmem [shape: bf16[32,16], index: 7, kind: input, shape index: {}]   ;;  %s588_s8 = inlined_call_operand.vmem [shape: f32[1,16], index: 8, kind: input, shape index: {}]   ;;  %s589_s9 = inlined_call_operand.vmem [shape: f32[2,8], index: 9, kind: input, shape index: {}]   ;;  %s590_s10 = inlined_call_operand.hbm [shape: f32[2,24], index: 10, kind: output, shape index: {}]  }
   0x1   :  { %v39_v0 = vld [vmem:[%s582_s2] sm:$0x3]  ;;  %387 = vmatprep.subr.bf16.mxu0 %v454_v2  ;;  %389 = vmatprep.mubr.msk.bf16.mxu0 %vm455_vm1, %v454_v2  ;;  %v38_v4 = vld [vmem:[%s580_s0 + $0x8] sm:$0xff] }
   0x2   :  { %v37_v1 = vld [vmem:[%s580_s0] sm:$0xff]  ;;  %v49_v3 = vsel %vm47_vm0, %v39_v0, 0  ;;  %393 = vmatprep.subr.bf16.mxu1 %v454_v2  ;;  %397 = vmatprep.mubr.msk.bf16.mxu1 %vm455_vm1, %v454_v2 }
   0x3   :  { %388 = vmatpush3.bf16.msra.mxu0 %v49_v3  ;;  %v40_v5 = vpack.c.bf16 %v38_v4, %v37_v1 }
   0x4   :  { %401 = vmatprep.subr.bf16.mxu0 %v454_v2 }
   0x6   :  { %390 = vmatmul.mubr.msk.bf16.vlgmr.msra.gmra.mrb[0].mxu0 %vm43_vm2, %v40_v5 }
   0x7   :  { %15 = vsyncpa [#allocation3], 0  ;;  %405 = vmatprep.mubr.msk.bf16.mxu0 %vm455_vm1, %v454_v2  ;;  %v422_v6 = vld [vmem:[%s583_s3] sm:$0xff]   ;;  %v423_v7 = vld [vmem:[%s583_s3 + $0x8] sm:$0xff]   ;;  %vm116_vm3 = vcmask 261120   ;;  %vm194_vm4 = vcmask 1041409  }
   0x8   :  { %394 = vmatpush3.bf16.msra.mxu1 %v422_v6  ;;  %v41_v8 = vld [vmem:[%s581_s1] sm:$0xff]  ;;  %v42_v10 = vld [vmem:[%s581_s1 + $0x8] sm:$0xff]  ;;  %s456_s13 = smov 8   ;;  %vm343_vm5 = vcmask 64512   ;;  %vm345_vm6 = vcmask 130048   ;;  %vm347_vm7 = vcmask 189440  }
   0x9   :  { %395 = vmatprep.subr.bf16.mxu1 %v454_v2  ;;  %v424_v17 = vld [vmem:[%s585_s5] sm:$0xff]   ;;  %v425_v18 = vld [vmem:[%s585_s5 + $0x8] sm:$0xff]  }
   0xa   :  { %402 = vmatpush3.bf16.msra.mxu0 %v424_v17  ;;  %v426_v19 = vld [vmem:[%s587_s7] sm:$0xff]   ;;  %v427_v49 = vld [vmem:[%s587_s7 + $0x8] sm:$0xff]  }
   0xb   :  { %403 = vmatprep.subr.bf16.mxu0 %v454_v2  ;;  %v364_v20 = vld [vmem:[%s584_s4] ss:$0 sm:$0xff] }
   0xc   :  { %396 = vmatpush3.bf16.msra.mxu1 %v423_v7  ;;  %v324_v50 = vld [vmem:[%s589_s9] sm:$0x3] }
   0xd   :  { %409 = vmatprep.subr.bf16.mxu1 %v454_v2  ;;  %326 = vrot.lane.b32.xlu0 %v324_v50, %s456_s13  ;;  %v368_v51 = vld [vmem:[%s586_s6] ss:$0 sm:$0xff]  ;;  %s457_s6 = smov 120  }
   0xe   :  { %404 = vmatpush3.bf16.msra.mxu0 %v425_v18  ;;  %v372_v59 = vld [vmem:[%s588_s8] ss:$0 sm:$0xff]  ;;  %s458_s8 = smov [#allocation2]  }
   0xf   :  { %s355_s9 = sshll.u32 %s458_s8, 4  ;;  %s356_s9 = int_to_ptr.vmem [resolvable:$true] %s355_s9 }
  0x10   :  { %s430_s17 = scalar_lea.vmem %s356_s9, 32  ;;  %p435_p1 = scmp.lt.s32.totalorder %s356_s9, %s356_s9 }
  0x11   :  { %p431_p0 = scmp.ne.s32.totalorder %s356_s9, %s430_s17  ;;  %p436_p2 = scmp.lt.s32.totalorder %s430_s17, %s430_s17 }
  0x13   :  { %p437_p3 = por %p436_p2, %p435_p1 }
  0x15   :  { %p438_p4 = pnand %p437_p3, %p431_p0 }
  0x7f   :  { %v327_v4 = vpop.permute.xlu0 %326 }
  0xd9   :  { %v85_v9 = vpop.f32.mrb[0].mxu0 }
  0xda   :  { %v391_v11 = vpop.f32.mrb[1].mxu0  ;;  %v86_v13 = vadd.f32 %v85_v9, %v41_v8 }
  0xdb   :  { %v88_v12 = vpop.f32.mrb[2].mxu0 }
  0xdc   :  { %v89_v14 = vadd.f32 %v88_v12, %v42_v10  ;;  %v392_v15 = vpop.f32.mrb[3].mxu0 }
  0xde   :  { %v96_v16 = vpack.c.bf16 %v89_v14, %v86_v13 }
  0xe0   :  { %398 = vmatmul.mubr.msk.bf16.vlgmr.msra.gmra.mrb[0].mxu1 %vm116_vm3, %v96_v16 }
  0xe1   :  { %413 = vmatprep.mubr.msk.bf16.mxu1 %vm455_vm1, %v454_v2  ;;  %410 = vmatpush3.bf16.msra.mxu1 %v426_v19 }
  0xe2   :  { %411 = vmatprep.subr.bf16.mxu1 %v454_v2 }
  0xe5   :  { %412 = vmatpush3.bf16.msra.mxu1 %v427_v49 }
 0x1b3   :  { %v154_v21 = vpop.f32.mrb[0].mxu1 }
 0x1b4   :  { %v155_v22 = vadd.f32 %v364_v20, %v154_v21  ;;  %v399_v23 = vpop.f32.mrb[1].mxu1 }
 0x1b5   :  { %v157_v24 = vpop.f32.mrb[2].mxu1 }
 0x1b6   :  { %v161_v25 = vmax.f32 %v155_v22, 0.0  ;;  %v158_v26 = vadd.f32 %v364_v20, %v157_v24  ;;  %v400_v27 = vpop.f32.mrb[3].mxu1 }
 0x1b8   :  { %v163_v28 = vsel %vm116_vm3, %v161_v25, 0.0  ;;  %v162_v29 = vmax.f32 %v158_v26, 0.0 }
 0x1b9   :  { %v164_v30 = vrot.slane %v163_v28, 4 }
 0x1ba   :  { %v170_v31 = vsel %vm116_vm3, %v162_v29, 0.0 }
 0x1bb   :  { %v165_v32 = vadd.f32 %v164_v30, %v163_v28  ;;  %v171_v33 = vrot.slane %v170_v31, 4 }
 0x1bd   :  { %v166_v34 = vrot.slane %v165_v32, 2  ;;  %v172_v35 = vadd.f32 %v171_v33, %v170_v31 }
 0x1bf   :  { %v167_v36 = vadd.f32 %v166_v34, %v165_v32  ;;  %v173_v37 = vrot.slane %v172_v35, 2 }
 0x1c1   :  { %v168_v38 = vrot.slane %v167_v36, 1  ;;  %v174_v39 = vadd.f32 %v173_v37, %v172_v35 }
 0x1c3   :  { %v169_v40 = vadd.f32 %v168_v38, %v167_v36  ;;  %v175_v41 = vrot.slane %v174_v39, 1 }
 0x1c5   :  { %v181_v42 = vpack.c.bf16 %v169_v40, %v169_v40  ;;  %v176_v43 = vadd.f32 %v175_v41, %v174_v39 }
 0x1c7   :  { %v182_v44 = vpack.c.bf16 %v176_v43, %v176_v43  ;;  %v192_v45 = vunpack.c.l.b16 %v181_v42 }
 0x1c9   :  { %v193_v46 = vunpack.c.l.b16 %v182_v44 }
 0x1cb   :  { %v195_v47 = vsel %vm194_vm4, %v193_v46, %v192_v45 }
 0x1cc   :  { %v196_v48 = vpack.c.b16 %v195_v47, %v195_v47 }
 0x1ce   :  { %406 = vmatmul.mubr.msk.bf16.vlgmr.msra.gmra.mrb[4].mxu0 %vm116_vm3, %v196_v48 }
 0x2a1   :  { %v246_v52 = vpop.f32.mrb[4].mxu0 }
 0x2a2   :  { %v247_v53 = vadd.f32 %v368_v51, %v246_v52  ;;  %v407_v54 = vpop.f32.mrb[5].mxu0 }
 0x2a3   :  { %v249_v55 = vpop.f32.mrb[6].mxu0 }
 0x2a4   :  { %v252_v56 = vmax.f32 %v247_v53, 0.0  ;;  %v408_v57 = vpop.f32.mrb[7].mxu0 }
 0x2a6   :  { %v257_v58 = vpack.c.bf16 %v252_v56, %v252_v56 }
 0x2a8   :  { %414 = vmatmul.mubr.msk.bf16.vlgmr.msra.gmra.mrb[4].mxu1 %vm116_vm3, %v257_v58 }
 0x37b   :  { %v314_v60 = vpop.f32.mrb[4].mxu1 }
 0x37c   :  { %v315_v61 = vadd.f32 %v372_v59, %v314_v60  ;;  %v415_v62 = vpop.f32.mrb[5].mxu1 }
 0x37d   :  { %v317_v63 = vpop.f32.mrb[6].mxu1 }
 0x37e   :  { %v320_v0 = vmax.f32 %v315_v61, -20.0  ;;  %336 = vrot.lane.b32.xlu1 %v315_v61, %s456_s13  ;;  %v416_v1 = vpop.f32.mrb[7].mxu1 }
 0x380   :  { %v321_v2 = vmin.f32 %v320_v0, 2.0 }
 0x382   :  { %v322_v3 = vmul.f32 1.442695, %v321_v2 }
 0x384   :  { %428 = vpow2.f32 %v322_v3 }
 0x38e   :  { %v429_v5 = vpop.eup %428 }
 0x38f   :  { %v329_v6 = vmul.f32 %v429_v5, %v327_v4  ;;  %340 = vrot.lane.b32.xlu1 %v429_v5, %s456_s13 }
 0x391   :  { %331 = vrot.lane.b32.xlu0 %v329_v6, %s457_s6 }
 0x3f0   :  { %v337_v7 = vpop.permute.xlu1 %336 }
 0x401   :  { %v341_v10 = vpop.permute.xlu1 %340 }
 0x403   :  { %v332_v8 = vpop.permute.xlu0 %331 }
 0x404   :  { %v334_v9 = vadd.f32 %v332_v8, %v315_v61 }
 0x406   :  { %v344_v11 = vsel %vm343_vm5, %v334_v9, %v337_v7 }
 0x407   :  { %v346_v12 = vsel %vm345_vm6, %v344_v11, %v341_v10 }
 0x408   :  { %348 = vst.msk [vmem:[#allocation2] sm:$0x3] %vm347_vm7, %v346_v12 }
 0x409   :  { %441 = shalt.err (!%p438_p4)
}
 0x40a   :  { %s442_s19 = scalar_lea.hbm %s590_s10, 32 }
 0x40b   :  { %p443_p5 = scmp.ne.s32.totalorder %s590_s10, %s442_s19  ;;  %p446_p6 = scmp.lt.u32.totalorder %s442_s19, %s590_s10 }
 0x40d   :  { %p448_p7 = pnand %p446_p6, %p443_p5 }
 0x40f   :  { %451 = shalt.err (!%p448_p7)
}
 0x410   :  { %358 = dma.vmem_to_hbm [thread:$0]  %s356_s9, 32, %s590_s10, [#allocation3]  }
 0x411   :  { %452 = dma.done.wait [#allocation3], 32  }
 0x412   :  { %453 = vsyncadd [#allocation3], 4294967264 }
 0x413   :  { %362 = vsyncpa [#allocation3], 1 }

</bundles_post_ra>
